<compile_context>
chip_gen: v6e
topology: v6e:2x2x1
jax: 0.10.0
libtpu: 0.0.40
codegen_flags: <defaults>
</compile_context>

<pallas_src>
import numpy as np
import jax
import jax.numpy as jnp
from jax.experimental import pallas as pl
from jax.experimental.pallas import tpu as pltpu


# ---------------------------------------------------------------------------
# Helpers
# ---------------------------------------------------------------------------
def round_up(x, m):
    return ((x + m - 1) // m) * m


def diffsort(offsets):
    # JAX port of the torch helper (row ordering by descending row length).
    diffs = (offsets - jnp.roll(offsets, -1))[:-1]
    return jnp.argsort(-diffs).astype(jnp.int32)


def csr_to_dense_kt(values, row_offsets, column_indices, m, k):
    """Scatter CSR entries directly into a dense (K, M) = W^T weight matrix.

    Built transposed on purpose so the kernel can contract x(BS,K) @ wt(K,M)
    without a separate transpose pass over the weight.
    """
    nnz = values.shape[0]
    rows = jnp.searchsorted(row_offsets, jnp.arange(nnz), side="right") - 1
    # .add (not .set) so duplicate (row, col) entries accumulate like a real SpMM.
    wt = jnp.zeros((k, m), jnp.float32)
    wt = wt.at[column_indices, rows].add(values)
    return wt


# ---------------------------------------------------------------------------
# Pallas kernel: tiled (BS, K) @ (K, M) -> (BS, M) with f32 accumulator
# ---------------------------------------------------------------------------
def spmm_kernel(x_ref, wt_ref, o_ref, acc_ref):
    k = pl.program_id(2)

    @pl.when(k == 0)
    def _():
        acc_ref[...] = jnp.zeros_like(acc_ref)

    acc_ref[...] += jnp.dot(
        x_ref[...], wt_ref[...], preferred_element_type=jnp.float32
    )

    @pl.when(k == pl.num_programs(2) - 1)
    def _():
        o_ref[...] = acc_ref[...].astype(o_ref.dtype)


def sparse_linear_forward(x, values, row_indices, row_offsets, column_indices):
    """Forward pass of SparseLinear.

    x: (B, S, K) float32
    returns (B, S, M) float32 with M = row_indices.shape[-1] (== output_features)

    Note: row_indices (sputnik's diffsort load-balancing permutation) does not
    change the math; it is accepted for API parity but unused here.
    """
    del row_indices  # load-balancing hint only; not needed for a dense-tile SpMM
    B, S, K = x.shape
    M = row_offsets.shape[0] - 1          # output_features

    # Dense (K, M) weight from CSR (JAX glue), cast to bf16 for the MXU.
    wt = csr_to_dense_kt(values, row_offsets, column_indices, M, K)   # (K, M)

    BS = B * S
    # Tile sizes: lane-dense (mult-of-128) N/K tiles, sublane-aligned M-tile,
    # deep-enough K tile to amortize per-grid-step overhead.
    TM_MAX, TN_MAX, TK_MAX = 256, 256, 512
    tm = min(TM_MAX, round_up(BS, 8))
    tn = min(TN_MAX, round_up(M, 128))
    tk = min(TK_MAX, round_up(K, 128))

    BS_p = round_up(BS, tm)
    M_p = round_up(M, tn)
    K_p = round_up(K, tk)

    x2 = x.reshape(BS, K).astype(jnp.bfloat16)
    x2p = jnp.pad(x2, ((0, BS_p - BS), (0, K_p - K)))
    wtp = jnp.pad(wt.astype(jnp.bfloat16), ((0, K_p - K), (0, M_p - M)))

    grid = (BS_p // tm, M_p // tn, K_p // tk)

    # VMEM budget per step (double-buffered inputs/outputs + f32 accumulator);
    # 32 MiB is well under v7x's 64 MiB physical VMEM and fine on v5e/v6e.
    vmem_limit = 32 * 1024 * 1024

    cost = pl.CostEstimate(
        flops=2 * BS_p * K_p * M_p,
        transcendentals=0,
        bytes_accessed=(BS_p * K_p + K_p * M_p) * 2 + BS_p * M_p * 4,
    )

    out = pl.pallas_call(
        spmm_kernel,
        out_shape=jax.ShapeDtypeStruct((BS_p, M_p), jnp.float32),
        grid_spec=pltpu.PrefetchScalarGridSpec(
            num_scalar_prefetch=0,
            grid=grid,
            in_specs=[
                pl.BlockSpec((tm, tk), lambda i, j, k: (i, k)),
                pl.BlockSpec((tk, tn), lambda i, j, k: (k, j)),
            ],
            out_specs=pl.BlockSpec((tm, tn), lambda i, j, k: (i, j)),
            scratch_shapes=[pltpu.VMEM((tm, tn), jnp.float32)],
        ),
        compiler_params=pltpu.CompilerParams(
            dimension_semantics=("parallel", "parallel", "arbitrary"),
            vmem_limit_bytes=vmem_limit,
        ),
        cost_estimate=cost,
    )(x2p, wtp)

    return out[:BS, :M].reshape(B, S, M)


# ---------------------------------------------------------------------------
# Deterministic parameter construction (synthetic; no checkpoint load)
# ---------------------------------------------------------------------------
def build_sparse_params(key, output_features, input_features, density=0.5):
    kw, km = jax.random.split(key)
    w = jax.random.normal(kw, (output_features, input_features), jnp.float32)
    mask = jax.random.bernoulli(km, density, (output_features, input_features))
    w_sparse = np.asarray(w * mask)
    mask_np = np.asarray(mask)

    values, col_idx, row_off = [], [], [0]
    for r in range(output_features):
        cols = np.nonzero(mask_np[r])[0]
        values.extend(w_sparse[r, cols].tolist())
        col_idx.extend(cols.tolist())
        row_off.append(len(values))

    values = jnp.asarray(values, jnp.float32)
    column_indices = jnp.asarray(col_idx, jnp.int32)
    row_offsets = jnp.asarray(row_off, jnp.int32)
    row_indices = diffsort(row_offsets)          # length == output_features
    return values, row_indices, row_offsets, column_indices, jnp.asarray(w_sparse)


if __name__ == "__main__":
    B, S = 2, 8
    input_features, output_features = 32, 16

    key = jax.random.PRNGKey(0)
    kx, kp = jax.random.split(key)

    x = jax.random.normal(kx, (B, S, input_features), jnp.float32)
    (values, row_indices, row_offsets, column_indices,
     w_sparse_dense) = build_sparse_params(kp, output_features, input_features)

    y = sparse_linear_forward(x, values, row_indices, row_offsets, column_indices)
    y = jax.block_until_ready(y)
    assert y.shape == (B, S, output_features)

    # Reference 1 (tight): same bf16 inputs, f32 accumulation -> kernel should match closely.
    ref_bf16 = jnp.einsum(
        "bsk,mk->bsm",
        x.astype(jnp.bfloat16),
        (w_sparse_dense.astype(jnp.bfloat16)),
        preferred_element_type=jnp.float32,
    )
    np.testing.assert_allclose(np.asarray(y), np.asarray(ref_bf16), rtol=1e-3, atol=1e-3)

    # Reference 2 (semantic, loose): exact f32 math of the torch module; loose
    # tolerance because the kernel casts inputs to bf16 for the MXU.
    ref_f32 = jnp.einsum("bsk,mk->bsm", x, w_sparse_dense)
    np.testing.assert_allclose(np.asarray(y), np.asarray(ref_f32), rtol=1e-1, atol=1e-1)

    print("KERNEL_OK")
</pallas_src>

<mosaic_0001>
module attributes {stable_mosaic.version = 11 : i64} {
  func.func @spmm_kernel(%arg0: i32, %arg1: i32, %arg2: i32, %arg3: memref<16x128xbf16, #tpu.memory_space<vmem>>, %arg4: memref<128x128xbf16, #tpu.memory_space<vmem>>, %arg5: memref<16x128xf32, #tpu.memory_space<vmem>>, %arg6: memref<16x128xf32, #tpu.memory_space<vmem>>) attributes {dimension_semantics = [#tpu.dimension_semantics<parallel>, #tpu.dimension_semantics<parallel>, #tpu.dimension_semantics<arbitrary>], iteration_bounds = array<i64: 1, 1, 1>, scalar_prefetch = 0 : i64, scratch_operands = 1 : i64, tpu.core_type = #tpu.core_type<tc>, window_params = [{transform_indices = @transform_0, window_bounds = array<i64: 16, 128>}, {transform_indices = @transform_1, window_bounds = array<i64: 128, 128>}, {transform_indices = @transform_2, window_bounds = array<i64: 16, 128>}]} {
    %c0_i32 = arith.constant 0 : i32
    %0 = arith.cmpi eq, %arg2, %c0_i32 : i32
    %1 = arith.extui %0 : i1 to i32
    %c0_i32_0 = arith.constant 0 : i32
    %2 = arith.cmpi ne, %1, %c0_i32_0 : i32
    scf.if %2 {
      %cst_10 = arith.constant 0.000000e+00 : f32
      %12 = vector.broadcast %cst_10 : f32 to vector<16x128xf32>
      %c0_11 = arith.constant 0 : index
      %c0_12 = arith.constant 0 : index
      %13 = vector.load %arg6[%c0_11, %c0_12] : memref<16x128xf32, #tpu.memory_space<vmem>>, vector<16x128xf32>
      tpu.vector_store %arg6[%c0_11, %c0_12], %12 {strides = array<i32>} : memref<16x128xf32, #tpu.memory_space<vmem>>, vector<16x128xf32>,
    } else {
    }
    %c0 = arith.constant 0 : index
    %c0_1 = arith.constant 0 : index
    %3 = vector.load %arg6[%c0, %c0_1] : memref<16x128xf32, #tpu.memory_space<vmem>>, vector<16x128xf32>
    %c0_2 = arith.constant 0 : index
    %c0_3 = arith.constant 0 : index
    %4 = vector.load %arg3[%c0_2, %c0_3] : memref<16x128xbf16, #tpu.memory_space<vmem>>, vector<16x128xbf16>
    %c0_4 = arith.constant 0 : index
    %c0_5 = arith.constant 0 : index
    %5 = vector.load %arg4[%c0_4, %c0_5] : memref<128x128xbf16, #tpu.memory_space<vmem>>, vector<128x128xbf16>
    %cst = arith.constant dense<0.000000e+00> : vector<16x128xf32>
    %6 = tpu.matmul %4, %5, %cst {dimension_numbers = #tpu.dot_dimension_numbers<[1], [0], [0], [1], [0, 0, 1, 1], [], []>} : vector<16x128xbf16>, vector<128x128xbf16>, vector<16x128xf32> -> vector<16x128xf32>
    %7 = arith.addf %3, %6 : vector<16x128xf32>
    %c0_6 = arith.constant 0 : index
    %c0_7 = arith.constant 0 : index
    %8 = vector.load %arg6[%c0_6, %c0_7] : memref<16x128xf32, #tpu.memory_space<vmem>>, vector<16x128xf32>
    tpu.vector_store %arg6[%c0_6, %c0_7], %7 {strides = array<i32>} : memref<16x128xf32, #tpu.memory_space<vmem>>, vector<16x128xf32>,
    %c0_i32_8 = arith.constant 0 : i32
    %9 = arith.cmpi eq, %arg2, %c0_i32_8 : i32
    %10 = arith.extui %9 : i1 to i32
    %c0_i32_9 = arith.constant 0 : i32
    %11 = arith.cmpi ne, %10, %c0_i32_9 : i32
    scf.if %11 {
      %c0_10 = arith.constant 0 : index
      %c0_11 = arith.constant 0 : index
      %12 = vector.load %arg6[%c0_10, %c0_11] : memref<16x128xf32, #tpu.memory_space<vmem>>, vector<16x128xf32>
      %c0_12 = arith.constant 0 : index
      %c0_13 = arith.constant 0 : index
      %13 = vector.load %arg5[%c0_12, %c0_13] : memref<16x128xf32, #tpu.memory_space<vmem>>, vector<16x128xf32>
      tpu.vector_store %arg5[%c0_12, %c0_13], %12 {strides = array<i32>} : memref<16x128xf32, #tpu.memory_space<vmem>>, vector<16x128xf32>,
    } else {
    }
    return
  }
  func.func @transform_0(%arg0: i32, %arg1: i32, %arg2: i32) -> (i32, i32) {
    %c0_i32 = arith.constant 0 : i32
    return %arg0, %arg2 : i32, i32
  }
  func.func @transform_1(%arg0: i32, %arg1: i32, %arg2: i32) -> (i32, i32) {
    %c0_i32 = arith.constant 0 : i32
    return %arg2, %arg1 : i32, i32
  }
  func.func @transform_2(%arg0: i32, %arg1: i32, %arg2: i32) -> (i32, i32) {
    %c0_i32 = arith.constant 0 : i32
    return %arg0, %arg1 : i32, i32
  }
}

</mosaic_0001>

<bundles_post_ra>
// kernel: tpu_custom_call.1
= control target key start
LH: loop header
LB: loop body
LE: loop exit
PB: predicated region body
PF: predicated region fallthrough
CT: control target
= control target key end

     0   :  { %7 = vsyncpa [#allocation4], 0  ;;  %s346_s0 = inlined_call_operand.hbm [shape: bf16[16,128], index: 0, kind: input, shape index: {}]   ;;  %s347_s1 = inlined_call_operand.hbm [shape: bf16[128,128], index: 1, kind: input, shape index: {}]   ;;  %s348_s2 = inlined_call_operand.hbm [shape: f32[16,128], index: 2, kind: output, shape index: {}]  }
   0x1   :  { %8 = vsyncpa [#allocation7], 0 }
   0x2   :  { %9 = vsyncpa [#allocation5], 0  ;;  %s313_s9 = smov [#allocation3]  }
   0x3   :  { %s15_s10 = sshll.u32 %s313_s9, 4  ;;  %s16_s10 = int_to_ptr.vmem [resolvable:$true] %s15_s10 }
   0x4   :  { %s255_s11 = scalar_lea.vmem %s16_s10, 128  ;;  %p260_p1 = scmp.lt.s32.totalorder %s16_s10, %s16_s10 }
   0x5   :  { %p256_p0 = scmp.ne.s32.totalorder %s16_s10, %s255_s11  ;;  %p261_p2 = scmp.lt.s32.totalorder %s255_s11, %s255_s11 }
   0x7   :  { %p262_p3 = por %p261_p2, %p260_p1 }
   0x9   :  { %p263_p4 = pnand %p262_p3, %p256_p0 }
   0xb   :  { %266 = shalt.err (!%p263_p4)
}
   0xc   :  { %s314_s12 = smov 64   ;;  %s315_s13 = smov 4  }
   0xd   :  { %21 = dma.hbm_to_vmem [thread:$0]  %s346_s0, 128, %s16_s10, [#allocation4], %s314_s12, %s314_s12, %s315_s13  }
   0xe   :  { %s316_s16 = smov [#allocation6]  }
   0xf   :  { %s27_s17 = sshll.u32 %s316_s16, 4  ;;  %s28_s17 = int_to_ptr.vmem [resolvable:$true] %s27_s17 }
  0x10   :  { %s275_s18 = scalar_lea.vmem %s28_s17, 1024  ;;  %p280_p6 = scmp.lt.s32.totalorder %s28_s17, %s28_s17 }
  0x11   :  { %p276_p5 = scmp.ne.s32.totalorder %s28_s17, %s275_s18  ;;  %p281_p7 = scmp.lt.s32.totalorder %s275_s18, %s275_s18 }
  0x13   :  { %p282_p8 = por %p281_p7, %p280_p6 }
  0x15   :  { %p283_p9 = pnand %p282_p8, %p276_p5 }
  0x17   :  { %286 = shalt.err (!%p283_p9)
}
  0x18   :  { %33 = dma.hbm_to_vmem [thread:$0]  %s347_s1, 1024, %s28_s17, [#allocation7], %s314_s12, %s314_s12, %s315_s13  }
  0x19   :  { %307 = dma.done.wait [#allocation4], 128  }
  0x1a   :  { %308 = vsyncadd [#allocation4], 4294967168 }
  0x1b   :  { %309 = dma.done.wait [#allocation7], 1024  }
  0x1c   :  { %310 = vsyncadd [#allocation7], 4294966272  ;;  %v317_v0 = vmov 0.0   ;;  %vm318_vm0 = vmmov 0   ;;  %v238_v1 = vld [vmem:[#allocation6 + $0x38] sm:$0xff]   ;;  %v239_v2 = vld [vmem:[#allocation6 + $0x30] sm:$0xff]  }
  0x1d   :  { %209 = vmatprep.subr.bf16.mxu0 %v317_v0  ;;  %225 = vmatprep.mubr.msk.bf16.mxu0 %vm318_vm0, %v317_v0  ;;  %v240_v3 = vld [vmem:[#allocation6 + $0x28] sm:$0xff]   ;;  %v241_v4 = vld [vmem:[#allocation6 + $0x20] sm:$0xff]   ;;  %v242_v5 = vld [vmem:[#allocation6 + $0x18] sm:$0xff]   ;;  %s319_s0 = smov [#allocation8]  }
  0x1e   :  { %210 = vmatpush3.bf16.msra.mxu0 %v238_v1  ;;  %v243_v6 = vld [vmem:[#allocation6 + $0x10] sm:$0xff]   ;;  %v244_v7 = vld [vmem:[#allocation6 + $0x8] sm:$0xff]   ;;  %v245_v8 = vld [vmem:[#allocation6] sm:$0xff]   ;;  %s178_s1 = sshll.u32 %s319_s0, 4  ;;  %s179_s1 = int_to_ptr.vmem [resolvable:$true] %s178_s1 }
  0x1f   :  { %211 = vmatprep.subr.bf16.mxu0 %v317_v0  ;;  %v246_v9 = vld [vmem:[#allocation3] sm:$0xff]   ;;  %s287_s21 = scalar_lea.vmem %s179_s1, 256  ;;  %p292_p11 = scmp.lt.s32.totalorder %s179_s1, %s179_s1 }
  0x20   :  { %p288_p10 = scmp.ne.s32.totalorder %s179_s1, %s287_s21  ;;  %p293_p12 = scmp.lt.s32.totalorder %s287_s21, %s287_s21 }
  0x22   :  { %212 = vmatpush3.bf16.msra.mxu0 %v239_v2  ;;  %p294_p13 = por %p293_p12, %p292_p11 }
  0x23   :  { %213 = vmatprep.subr.bf16.mxu0 %v317_v0 }
  0x24   :  { %p295_p0 = pnand %p294_p13, %p288_p10 }
  0x26   :  { %214 = vmatpush3.bf16.msra.mxu0 %v240_v3 }
  0x27   :  { %215 = vmatprep.subr.bf16.mxu0 %v317_v0 }
  0x2a   :  { %216 = vmatpush3.bf16.msra.mxu0 %v241_v4 }
  0x2b   :  { %217 = vmatprep.subr.bf16.mxu0 %v317_v0 }
  0x2e   :  { %218 = vmatpush3.bf16.msra.mxu0 %v242_v5 }
  0x2f   :  { %219 = vmatprep.subr.bf16.mxu0 %v317_v0 }
  0x32   :  { %220 = vmatpush3.bf16.msra.mxu0 %v243_v6 }
  0x33   :  { %221 = vmatprep.subr.bf16.mxu0 %v317_v0 }
  0x36   :  { %222 = vmatpush3.bf16.msra.mxu0 %v244_v7 }
  0x37   :  { %223 = vmatprep.subr.bf16.mxu0 %v317_v0 }
  0x3a   :  { %224 = vmatpush3.bf16.msra.mxu0 %v245_v8 }
  0x3d   :  { %226 = vmatmul.mubr.bf16.vlgmr.msra.gmra.mxu0 %v246_v9 }
  0xfd   :  { %v155_v10 = vpop.f32.mrf.mxu0 }
  0xfe   :  { %171 = vst [vmem:[#allocation8] sm:$0xff] %v155_v10 }
  0xff   :  { %v227_v11 = vpop.f32.mrf.mxu0 }
 0x101   :  { %v158_v12 = vpop.f32.mrf.mxu0 }
 0x102   :  { %172 = vst [vmem:[#allocation8 + $0x8] sm:$0xff] %v158_v12 }
 0x103   :  { %v228_v13 = vpop.f32.mrf.mxu0 }
 0x104   :  { %298 = shalt.err (!%p295_p0)
}
 0x105   :  { %s320_s22 = smov 128   ;;  %s321_s23 = smov 8  }
 0x106   :  { %184 = dma.vmem_to_hbm [thread:$0]  %s179_s1, 256, %s348_s2, [#allocation5], %s320_s22, %s320_s22, %s321_s23  }
 0x107   :  { %311 = dma.done.wait [#allocation5], 256  }
 0x108   :  { %312 = vsyncadd [#allocation5], 4294967040 }
 0x109   :  { %188 = vsyncpa [#allocation4], 1 }
 0x10a   :  { %189 = vsyncpa [#allocation7], 1 }
 0x10b   :  { %190 = vsyncpa [#allocation5], 1 }

</bundles_post_ra>
